<compile_context>
chip_gen: v5e
topology: v5e:2x2
jax: 0.10.0
libtpu: 0.0.40
codegen_flags: <defaults>
</compile_context>

<pallas_src>
import math

import jax
import jax.numpy as jnp
from jax.experimental import pallas as pl
from jax.experimental.pallas import tpu as pltpu


# ------------------------------ helpers --------------------------------------

def _round_up(x, m):
    return (x + m - 1) // m * m


def _pad_to(a, shape):
    pads = [(0, t - s) for s, t in zip(a.shape, shape)]
    return jnp.pad(a, pads) if any(p[1] for p in pads) else a


def _fused_leaky_relu(z, negative_slope=0.2, scale=2.0 ** 0.5):
    # StyleGAN2 fused_leaky_relu (bias already added by the caller).
    return jnp.where(z >= 0, z, negative_slope * z) * scale


# ------------------------------ Pallas kernel --------------------------------

def _make_fused_mlp_kernel(num_mid):
    """Kernel refs: x, w1, b1, (w_mid, b_mid)*num_mid, w_out, b_out, out, acc."""

    def kernel(*refs):
        x_ref, w1_ref, b1_ref = refs[0], refs[1], refs[2]
        mid_refs = refs[3:3 + 2 * num_mid]
        wo_ref, bo_ref = refs[3 + 2 * num_mid], refs[4 + 2 * num_mid]
        o_ref = refs[5 + 2 * num_mid]
        acc_ref = refs[6 + 2 * num_mid]

        k = pl.program_id(1)

        # ---- layer 1: K-tiled matmul with resident f32 accumulator ----------
        @pl.when(k == 0)
        def _init():
            acc_ref[...] = jnp.zeros_like(acc_ref)

        acc_ref[...] += jnp.dot(x_ref[...], w1_ref[...],
                                preferred_element_type=jnp.float32)

        # ---- epilogue at the last K step: bias + act, then the small layers -
        @pl.when(k == pl.num_programs(1) - 1)
        def _finalize():
            h = _fused_leaky_relu(acc_ref[...] + b1_ref[...])
            for i in range(num_mid):
                w = mid_refs[2 * i][...]
                b = mid_refs[2 * i + 1][...]
                z = jnp.dot(h.astype(w.dtype), w,
                            preferred_element_type=jnp.float32) + b
                h = _fused_leaky_relu(z)
            w_out = wo_ref[...]
            out = jnp.dot(h.astype(w_out.dtype), w_out,
                          preferred_element_type=jnp.float32) + bo_ref[...]
            o_ref[...] = out.astype(o_ref.dtype)

    return kernel


# ------------------------------ JAX wrapper -----------------------------------

def mlp_forward(params, x, *, tm=16, tk=512, compute_dtype=jnp.bfloat16):
    """params: list of layer dicts (weight (out,in), bias (out,), scale, lr_mul).
    x: (B, ...) float32; flattened to (B, in_dim) like x.view(x.size(0), -1)."""
    B = x.shape[0]
    x2 = x.reshape(B, -1).astype(jnp.float32)
    in_dim = x2.shape[1]
    n_layers = len(params)
    num_mid = n_layers - 2
    dim = params[0]["weight"].shape[0]
    out_dim = params[-1]["weight"].shape[0]

    # Effective (pre-scaled, transposed) weights / biases — tiny one-time glue.
    def eff(layer):
        w_t = (layer["weight"] * layer["scale"]).T             # (d_in, d_out)
        b = (layer["bias"] * layer["lr_mul"]).reshape(1, -1)   # (1, d_out)
        return w_t, b

    # Padded sizes: lane-dense (multiples of 128) features, sublane-dense batch.
    tk_eff = min(tk, _round_up(in_dim, 128))
    Kp = _round_up(in_dim, tk_eff)
    Dp = _round_up(dim, 128)
    Op = _round_up(out_dim, 128)
    Mp = _round_up(B, tm)

    x_p = _pad_to(x2, (Mp, Kp)).astype(compute_dtype)

    w1_t, b1 = eff(params[0])
    w1_p = _pad_to(w1_t, (Kp, Dp)).astype(compute_dtype)
    b1_p = _pad_to(b1, (1, Dp))

    mid_args, mid_specs = [], []
    for layer in params[1:-1]:
        w_t, b = eff(layer)
        mid_args += [_pad_to(w_t, (Dp, Dp)).astype(compute_dtype),
                     _pad_to(b, (1, Dp))]
        mid_specs += [pl.BlockSpec((Dp, Dp), lambda m, k: (0, 0)),
                      pl.BlockSpec((1, Dp), lambda m, k: (0, 0))]

    wo_t, bo = eff(params[-1])
    wo_p = _pad_to(wo_t, (Dp, Op)).astype(compute_dtype)
    bo_p = _pad_to(bo, (1, Op))

    # TODO(synk): for very large dim / n_layers the resident-weight fusion would need
    #             to fall back to per-layer tiled matmul calls (VMEM budget), not needed
    #             at the module defaults (dim=256).
    grid = (Mp // tm, Kp // tk_eff)

    out = pl.pallas_call(
        _make_fused_mlp_kernel(num_mid),
        out_shape=jax.ShapeDtypeStruct((Mp, Op), jnp.float32),
        grid=grid,
        in_specs=[
            pl.BlockSpec((tm, tk_eff), lambda m, k: (m, k)),   # x tile
            pl.BlockSpec((tk_eff, Dp), lambda m, k: (k, 0)),   # layer-1 weight tile
            pl.BlockSpec((1, Dp), lambda m, k: (0, 0)),        # layer-1 bias
            *mid_specs,                                        # mid weights/biases
            pl.BlockSpec((Dp, Op), lambda m, k: (0, 0)),       # out weight
            pl.BlockSpec((1, Op), lambda m, k: (0, 0)),        # out bias
        ],
        out_specs=pl.BlockSpec((tm, Op), lambda m, k: (m, 0)),
        scratch_shapes=[pltpu.VMEM((tm, Dp), jnp.float32)],
        compiler_params=pltpu.CompilerParams(
            dimension_semantics=("parallel", "arbitrary")),
    )(x_p, w1_p, b1_p, *mid_args, wo_p, bo_p)

    return out[:B, :out_dim]


# ------------------------------ parameter init --------------------------------

def init_mlp_params(key, in_dim, out_dim, dim=256, n_layers=3, lr_mul=1.0):
    """Mirrors MLP.__init__: EqualLinear(in,dim,act) + (n_layers-2)x EqualLinear(dim,dim,act)
    + EqualLinear(dim,out) (no activation, default lr_mul=1)."""
    dims = [in_dim] + [dim] * (n_layers - 1) + [out_dim]
    layers = []
    for i in range(n_layers):
        d_in, d_out = dims[i], dims[i + 1]
        layer_lr_mul = lr_mul if i < n_layers - 1 else 1.0   # last layer uses defaults
        key, kw = jax.random.split(key)
        weight = jax.random.normal(kw, (d_out, d_in), jnp.float32) / layer_lr_mul
        bias = jnp.zeros((d_out,), jnp.float32)              # bias_init = 0
        layers.append(dict(
            weight=weight,
            bias=bias,
            scale=(1.0 / math.sqrt(d_in)) * layer_lr_mul,
            lr_mul=layer_lr_mul,
        ))
    return layers


# ---------------------------------- main --------------------------------------

if __name__ == "__main__":
    key = jax.random.PRNGKey(0)
    kp, kx = jax.random.split(key)

    # small shapes consistent with MLP.forward's flatten: x.view(B, -1)
    B, C, H, W = 2, 4, 16, 16
    in_dim = C * H * W          # 1024
    dim, out_dim, n_layers = 256, 128, 3

    params = init_mlp_params(kp, in_dim, out_dim, dim=dim, n_layers=n_layers)
    x = jax.random.normal(kx, (B, C, H, W), jnp.float32)

    y = jax.jit(mlp_forward)(params, x)
    jax.block_until_ready(y)
    assert y.shape == (B, out_dim) and jnp.all(jnp.isfinite(y))
    print("KERNEL_OK")
</pallas_src>

<mosaic_0001>
module attributes {stable_mosaic.version = 11 : i64} {
  func.func @kernel(%arg0: i32, %arg1: i32, %arg2: memref<16x512xbf16, #tpu.memory_space<vmem>>, %arg3: memref<512x256xbf16, #tpu.memory_space<vmem>>, %arg4: memref<1x256xf32, #tpu.memory_space<vmem>>, %arg5: memref<256x256xbf16, #tpu.memory_space<vmem>>, %arg6: memref<1x256xf32, #tpu.memory_space<vmem>>, %arg7: memref<256x128xbf16, #tpu.memory_space<vmem>>, %arg8: memref<1x128xf32, #tpu.memory_space<vmem>>, %arg9: memref<16x128xf32, #tpu.memory_space<vmem>>, %arg10: memref<16x256xf32, #tpu.memory_space<vmem>>) attributes {dimension_semantics = [#tpu.dimension_semantics<parallel>, #tpu.dimension_semantics<arbitrary>], iteration_bounds = array<i64: 1, 2>, scalar_prefetch = 0 : i64, scratch_operands = 1 : i64, tpu.core_type = #tpu.core_type<tc>, window_params = [{transform_indices = @transform_0, window_bounds = array<i64: 16, 512>}, {transform_indices = @transform_1, window_bounds = array<i64: 512, 256>}, {pipeline_mode = #tpu.pipeline_mode<synchronous>, transform_indices = @transform_2, window_bounds = array<i64: 1, 256>}, {pipeline_mode = #tpu.pipeline_mode<synchronous>, transform_indices = @transform_3, window_bounds = array<i64: 256, 256>}, {pipeline_mode = #tpu.pipeline_mode<synchronous>, transform_indices = @transform_4, window_bounds = array<i64: 1, 256>}, {pipeline_mode = #tpu.pipeline_mode<synchronous>, transform_indices = @transform_5, window_bounds = array<i64: 256, 128>}, {pipeline_mode = #tpu.pipeline_mode<synchronous>, transform_indices = @transform_6, window_bounds = array<i64: 1, 128>}, {transform_indices = @transform_7, window_bounds = array<i64: 16, 128>}]} {
    %c0_i32 = arith.constant 0 : i32
    %0 = arith.cmpi eq, %arg1, %c0_i32 : i32
    %1 = arith.extui %0 : i1 to i32
    %c0_i32_0 = arith.constant 0 : i32
    %2 = arith.cmpi ne, %1, %c0_i32_0 : i32
    scf.if %2 {
      %cst_9 = arith.constant 0.000000e+00 : f32
      %12 = vector.broadcast %cst_9 : f32 to vector<16x256xf32>
      %c0_10 = arith.constant 0 : index
      %c0_11 = arith.constant 0 : index
      %13 = vector.load %arg10[%c0_10, %c0_11] : memref<16x256xf32, #tpu.memory_space<vmem>>, vector<16x256xf32>
      tpu.vector_store %arg10[%c0_10, %c0_11], %12 {strides = array<i32>} : memref<16x256xf32, #tpu.memory_space<vmem>>, vector<16x256xf32>,
    } else {
    }
    %c0 = arith.constant 0 : index
    %c0_1 = arith.constant 0 : index
    %3 = vector.load %arg10[%c0, %c0_1] : memref<16x256xf32, #tpu.memory_space<vmem>>, vector<16x256xf32>
    %c0_2 = arith.constant 0 : index
    %c0_3 = arith.constant 0 : index
    %4 = vector.load %arg2[%c0_2, %c0_3] : memref<16x512xbf16, #tpu.memory_space<vmem>>, vector<16x512xbf16>
    %c0_4 = arith.constant 0 : index
    %c0_5 = arith.constant 0 : index
    %5 = vector.load %arg3[%c0_4, %c0_5] : memref<512x256xbf16, #tpu.memory_space<vmem>>, vector<512x256xbf16>
    %cst = arith.constant dense<0.000000e+00> : vector<16x256xf32>
    %6 = tpu.matmul %4, %5, %cst {dimension_numbers = #tpu.dot_dimension_numbers<[1], [0], [0], [1], [0, 0, 1, 1], [], []>} : vector<16x512xbf16>, vector<512x256xbf16>, vector<16x256xf32> -> vector<16x256xf32>
    %7 = arith.addf %3, %6 : vector<16x256xf32>
    %c0_6 = arith.constant 0 : index
    %c0_7 = arith.constant 0 : index
    %8 = vector.load %arg10[%c0_6, %c0_7] : memref<16x256xf32, #tpu.memory_space<vmem>>, vector<16x256xf32>
    tpu.vector_store %arg10[%c0_6, %c0_7], %7 {strides = array<i32>} : memref<16x256xf32, #tpu.memory_space<vmem>>, vector<16x256xf32>,
    %c1_i32 = arith.constant 1 : i32
    %9 = arith.cmpi eq, %arg1, %c1_i32 : i32
    %10 = arith.extui %9 : i1 to i32
    %c0_i32_8 = arith.constant 0 : i32
    %11 = arith.cmpi ne, %10, %c0_i32_8 : i32
    scf.if %11 {
      %c0_9 = arith.constant 0 : index
      %c0_10 = arith.constant 0 : index
      %12 = vector.load %arg10[%c0_9, %c0_10] : memref<16x256xf32, #tpu.memory_space<vmem>>, vector<16x256xf32>
      %c0_11 = arith.constant 0 : index
      %c0_12 = arith.constant 0 : index
      %13 = vector.load %arg4[%c0_11, %c0_12] : memref<1x256xf32, #tpu.memory_space<vmem>>, vector<1x256xf32>
      %14 = vector.broadcast %13 : vector<1x256xf32> to vector<16x256xf32>
      %15 = arith.addf %12, %14 : vector<16x256xf32>
      %cst_13 = arith.constant 0.000000e+00 : f32
      %16 = vector.broadcast %cst_13 : f32 to vector<16x256xf32>
      %17 = arith.cmpf oge, %15, %16 : vector<16x256xf32>
      %cst_14 = arith.constant 2.000000e-01 : f32
      %18 = vector.broadcast %cst_14 : f32 to vector<16x256xf32>
      %19 = arith.mulf %18, %15 : vector<16x256xf32>
      %20 = arith.select %17, %15, %19 : vector<16x256xi1>, vector<16x256xf32>
      %cst_15 = arith.constant 1.41421354 : f32
      %21 = vector.broadcast %cst_15 : f32 to vector<16x256xf32>
      %22 = arith.mulf %20, %21 : vector<16x256xf32>
      %c0_16 = arith.constant 0 : index
      %c0_17 = arith.constant 0 : index
      %23 = vector.load %arg5[%c0_16, %c0_17] : memref<256x256xbf16, #tpu.memory_space<vmem>>, vector<256x256xbf16>
      %c0_18 = arith.constant 0 : index
      %c0_19 = arith.constant 0 : index
      %24 = vector.load %arg6[%c0_18, %c0_19] : memref<1x256xf32, #tpu.memory_space<vmem>>, vector<1x256xf32>
      %25 = arith.truncf %22 : vector<16x256xf32> to vector<16x256xbf16>
      %cst_20 = arith.constant dense<0.000000e+00> : vector<16x256xf32>
      %26 = tpu.matmul %25, %23, %cst_20 {dimension_numbers = #tpu.dot_dimension_numbers<[1], [0], [0], [1], [0, 0, 1, 1], [], []>} : vector<16x256xbf16>, vector<256x256xbf16>, vector<16x256xf32> -> vector<16x256xf32>
      %27 = vector.broadcast %24 : vector<1x256xf32> to vector<16x256xf32>
      %28 = arith.addf %26, %27 : vector<16x256xf32>
      %cst_21 = arith.constant 0.000000e+00 : f32
      %29 = vector.broadcast %cst_21 : f32 to vector<16x256xf32>
      %30 = arith.cmpf oge, %28, %29 : vector<16x256xf32>
      %cst_22 = arith.constant 2.000000e-01 : f32
      %31 = vector.broadcast %cst_22 : f32 to vector<16x256xf32>
      %32 = arith.mulf %31, %28 : vector<16x256xf32>
      %33 = arith.select %30, %28, %32 : vector<16x256xi1>, vector<16x256xf32>
      %cst_23 = arith.constant 1.41421354 : f32
      %34 = vector.broadcast %cst_23 : f32 to vector<16x256xf32>
      %35 = arith.mulf %33, %34 : vector<16x256xf32>
      %c0_24 = arith.constant 0 : index
      %c0_25 = arith.constant 0 : index
      %36 = vector.load %arg7[%c0_24, %c0_25] : memref<256x128xbf16, #tpu.memory_space<vmem>>, vector<256x128xbf16>
      %37 = arith.truncf %35 : vector<16x256xf32> to vector<16x256xbf16>
      %cst_26 = arith.constant dense<0.000000e+00> : vector<16x128xf32>
      %38 = tpu.matmul %37, %36, %cst_26 {dimension_numbers = #tpu.dot_dimension_numbers<[1], [0], [0], [1], [0, 0, 1, 1], [], []>} : vector<16x256xbf16>, vector<256x128xbf16>, vector<16x128xf32> -> vector<16x128xf32>
      %c0_27 = arith.constant 0 : index
      %c0_28 = arith.constant 0 : index
      %39 = vector.load %arg8[%c0_27, %c0_28] : memref<1x128xf32, #tpu.memory_space<vmem>>, vector<1x128xf32>
      %40 = vector.broadcast %39 : vector<1x128xf32> to vector<16x128xf32>
      %41 = arith.addf %38, %40 : vector<16x128xf32>
      %c0_29 = arith.constant 0 : index
      %c0_30 = arith.constant 0 : index
      %42 = vector.load %arg9[%c0_29, %c0_30] : memref<16x128xf32, #tpu.memory_space<vmem>>, vector<16x128xf32>
      tpu.vector_store %arg9[%c0_29, %c0_30], %41 {strides = array<i32>} : memref<16x128xf32, #tpu.memory_space<vmem>>, vector<16x128xf32>,
    } else {
    }
    return
  }
  func.func @transform_0(%arg0: i32, %arg1: i32) -> (i32, i32) {
    %c0_i32 = arith.constant 0 : i32
    return %arg0, %arg1 : i32, i32
  }
  func.func @transform_1(%arg0: i32, %arg1: i32) -> (i32, i32) {
    %c0_i32 = arith.constant 0 : i32
    %c0_i32_0 = arith.constant 0 : i32
    return %arg1, %c0_i32 : i32, i32
  }
  func.func @transform_2(%arg0: i32, %arg1: i32) -> (i32, i32) {
    %c0_i32 = arith.constant 0 : i32
    %c0_i32_0 = arith.constant 0 : i32
    %c0_i32_1 = arith.constant 0 : i32
    return %c0_i32, %c0_i32_0 : i32, i32
  }
  func.func @transform_3(%arg0: i32, %arg1: i32) -> (i32, i32) {
    %c0_i32 = arith.constant 0 : i32
    %c0_i32_0 = arith.constant 0 : i32
    %c0_i32_1 = arith.constant 0 : i32
    return %c0_i32, %c0_i32_0 : i32, i32
  }
  func.func @transform_4(%arg0: i32, %arg1: i32) -> (i32, i32) {
    %c0_i32 = arith.constant 0 : i32
    %c0_i32_0 = arith.constant 0 : i32
    %c0_i32_1 = arith.constant 0 : i32
    return %c0_i32, %c0_i32_0 : i32, i32
  }
  func.func @transform_5(%arg0: i32, %arg1: i32) -> (i32, i32) {
    %c0_i32 = arith.constant 0 : i32
    %c0_i32_0 = arith.constant 0 : i32
    %c0_i32_1 = arith.constant 0 : i32
    return %c0_i32, %c0_i32_0 : i32, i32
  }
  func.func @transform_6(%arg0: i32, %arg1: i32) -> (i32, i32) {
    %c0_i32 = arith.constant 0 : i32
    %c0_i32_0 = arith.constant 0 : i32
    %c0_i32_1 = arith.constant 0 : i32
    return %c0_i32, %c0_i32_0 : i32, i32
  }
  func.func @transform_7(%arg0: i32, %arg1: i32) -> (i32, i32) {
    %c0_i32 = arith.constant 0 : i32
    %c0_i32_0 = arith.constant 0 : i32
    return %arg0, %c0_i32 : i32, i32
  }
}

</mosaic_0001>

<bundles_post_ra>
// kernel: mlp_forward.1
= control target key start
LH: loop header
LB: loop body
LE: loop exit
PB: predicated region body
PF: predicated region fallthrough
CT: control target
= control target key end

     0   :  { %s2165_s24 = smov 0   ;;  %s2167_s25 = smov 0   ;;  %s2643_s0 = inlined_call_operand.vmem [shape: bf16[16,1024], index: 0, kind: input, shape index: {}]   ;;  %s2644_s1 = inlined_call_operand.vmem [shape: bf16[1024,256], index: 1, kind: input, shape index: {}]   ;;  %s2645_s2 = inlined_call_operand.vmem [shape: f32[1,256], index: 2, kind: input, shape index: {}]   ;;  %s2646_s3 = inlined_call_operand.vmem [shape: bf16[256,256], index: 3, kind: input, shape index: {}]   ;;  %s2647_s4 = inlined_call_operand.vmem [shape: f32[1,256], index: 4, kind: input, shape index: {}]   ;;  %s2648_s5 = inlined_call_operand.vmem [shape: bf16[256,128], index: 5, kind: input, shape index: {}]   ;;  %s2649_s6 = inlined_call_operand.vmem [shape: f32[1,128], index: 6, kind: input, shape index: {}]   ;;  %s2650_s7 = inlined_call_operand.vmem [shape: f32[16,128], index: 7, kind: output, shape index: {}]  }
   0x1   :  { %s2169_s26 = smov 0   ;;  %s2171_s27 = smov 0  }
   0x2   :  { %s2173_s28 = smov 0  }
   0x3 LB: > { %s26_s29 = sadd.s32 1, %s2118_s27  ;;  %p45_p1 = scmp.ne.s32.totalorder %s2110_s25, %s2106_s24  ;;  %s2122_s28 = sphi %s2173_s28, %s17_s28   ;;  %s2118_s27 = sphi %s2171_s27, %s2654_s27   ;;  %s2114_s26 = sphi %s2169_s26, %s2653_s26   ;;  %s2110_s25 = sphi %s2167_s25, %s2652_s25   ;;  %s2106_s24 = sphi %s2165_s24, %s2651_s24  }
   0x4   : > { %p27_p0 = scmp.ge.s32.totalorder %s26_s29, 2  ;;  %p46_p2 = scmp.eq.s32.totalorder %s2122_s28, 0 }
   0x5   : > { %s38_s8 = sadd.s32 1, %s2110_s25  ;;  %p1445_p5 = scmp.ge.s32.totalorder %s2122_s28, 2 }
   0x6   : > { %s2656_s29 = smov (%p27_p0, %s26_s29), 0  ;;  %p47_p3 = por %p46_p2, %p45_p1 }
   0x7   : > { %s34_s30 = ssub.s32 %s2118_s27, %s2656_s29  ;;  %243 = sbr.rel (%p1445_p5) target bundleno = 20 (0x14), region = 36 }
   0x8   : > { %p36_p4 = scmp.eq.s32.totalorder %s34_s30, 0 }
   0xa   : > { %s2200_s9 = scalar_select %p36_p4, %s2110_s25, %s38_s8  }
   0xc   : > { %246 = sbr.rel (!%p47_p3) target bundleno = 20 (0x14), region = 40  ;;  %s248_s10 = sand.u32 (%p47_p3), 1, %s2110_s25  }
   0xd   : > { %s1924_s11 = sshll.u32 (%p47_p3), %s2118_s27, 4  ;;  %s1446_s12 = sshll.u32 (%p47_p3), %s248_s10, 5 }
   0xe   : > { %s256_s15 = scalar_lea.vmem (%p47_p3), %s2643_s0, %s1924_s11  ;;  %s250_s16 = scalar_lea.vmem (%p47_p3), [#allocation3], %s1446_s12 }
   0xf   : > { %v269_v0 = vld [vmem:[%s256_s15] sm:$0xff] (%p47_p3)  ;;  %v271_v1 = vld [vmem:[%s256_s15 + $0x8] sm:$0xff] (%p47_p3) }
  0x10   : > { %v273_v2 = vld [vmem:[%s256_s15 + $0x20] sm:$0xff] (%p47_p3)  ;;  %270 = vst [vmem:[%s250_s16] sm:$0xff] (%p47_p3), %v269_v0  ;;  %v275_v3 = vld [vmem:[%s256_s15 + $0x28] sm:$0xff] (%p47_p3) }
  0x11   : > { %272 = vst [vmem:[%s250_s16 + $0x8] sm:$0xff] %v271_v1 }
  0x12   : > { %274 = vst [vmem:[%s250_s16 + $0x10] sm:$0xff] %v273_v2 }
  0x13   : > { %276 = vst [vmem:[%s250_s16 + $0x18] sm:$0xff] %v275_v3 }
  0x14 PF: > { %p1449_p6 = scmp.ge.s32.totalorder %s2122_s28, 1  ;;  %p291_p7 = scmp.lt.s32.totalorder %s2122_s28, 3 }
  0x16   : > { %p292_p8 = pnand %p1449_p6, %p291_p7 }
  0x17   : > { %s298_s17 = sand.u32 (!%p292_p8), 1, %s2106_s24   ;;  %s1451_s18 = sshll.u32 (!%p292_p8), %s2114_s26, 6 }
  0x18   : > { %295 = sbr.rel (%p292_p8) target bundleno = 578 (0x242), region = 67  ;;  %s1450_s19 = sshll.u32 (!%p292_p8), %s298_s17, 5 }
  0x19   : > { %p338_p9 = scmp.lt.s32.totalorder (!%p292_p8), %s1451_s18, 127  ;;  %s2217_s30 = scalar_lea.vmem (!%p292_p8), [#allocation3], %s1450_s19 }
  0x1a   : > { %p1454_p10 = scmp.ne.s32.totalorder (!%p292_p8), %s2114_s26, 0 }
  0x1d   : > { %s2658_s18 = smov (!%p338_p9, %s1451_s18), 127  ;;  %353 = sbr.rel (%p1454_p10) target bundleno = 39 (0x27), region = 75 }
  0x1e   : > { %s1925_s20 = sshll.u32 %s2658_s18, 3 }
  0x1f   : > { %s2215_s23 = scalar_lea.vmem %s2644_s1, %s1925_s20 }
  0x22   : > { %v2124_v4 = vmov 0.0  }
  0x23   : > { %354 = vst [vmem:[#allocation2 + $0x10] sm:$0xff] %v2124_v4 }
  0x24   : > { %355 = vst [vmem:[#allocation2] sm:$0xff] %v2124_v4 }
  0x25   : > { %356 = vst [vmem:[#allocation2 + $0x18] sm:$0xff] %v2124_v4 }
  0x26   : > { %357 = vst [vmem:[#allocation2 + $0x8] sm:$0xff] %v2124_v4 }
  0x27 PF: > { %v1529_v5 = vld [vmem:[%s2215_s23 + $0x70] sm:$0xf]  ;;  %v1945_v6 = vld [vmem:[%s2215_s23 + $0x74] sm:$0xf0]  ;;  %v1521_v16 = vld [vmem:[%s2215_s23 + $0x60] sm:$0xf] }
  0x28   : > { %v1593_v7 = vld [vmem:[%s2215_s23 + $0xf0] sm:$0xf]  ;;  %v1530_v8 = vor.u32 %v1945_v6, %v1529_v5  ;;  %v1961_v9 = vld [vmem:[%s2215_s23 + $0xf4] sm:$0xf0]  ;;  %v1943_v18 = vld [vmem:[%s2215_s23 + $0x64] sm:$0xf0] }
  0x29   : > { %v1657_v10 = vld [vmem:[%s2215_s23 + $0x170] sm:$0xf]  ;;  %v1977_v11 = vld [vmem:[%s2215_s23 + $0x174] sm:$0xf0]  ;;  %v1594_v12 = vor.u32 %v1961_v9, %v1593_v7  ;;  %v1585_v19 = vld [vmem:[%s2215_s23 + $0xe0] sm:$0xf]  ;;  %v1522_v21 = vor.u32 %v1943_v18, %v1521_v16 }
  0x2a   : > { %v1658_v13 = vor.u32 %v1977_v11, %v1657_v10  ;;  %v1721_v14 = vld [vmem:[%s2215_s23 + $0x1f0] sm:$0xf]  ;;  %v1993_v15 = vld [vmem:[%s2215_s23 + $0x1f4] sm:$0xf0]  ;;  %770 = vmatpush.bf16.msra.mxu0 %v1530_v8  ;;  %v1959_v20 = vld [vmem:[%s2215_s23 + $0xe4] sm:$0xf0] }
  0x2b   : > { %v1722_v17 = vor.u32 %v1993_v15, %v1721_v14  ;;  %784 = vmatpush.bf16.msra.mxu1 %v1594_v12  ;;  %v1586_v22 = vor.u32 %v1959_v20, %v1585_v19  ;;  %v1649_v23 = vld [vmem:[%s2215_s23 + $0x160] sm:$0xf]  ;;  %v1975_v24 = vld [vmem:[%s2215_s23 + $0x164] sm:$0xf0]  ;;  %v1513_v28 = vld [vmem:[%s2215_s23 + $0x50] sm:$0xf] }
  0x2c   : > { %798 = vmatpush.bf16.msra.mxu2 %v1658_v13  ;;  %v1713_v25 = vld [vmem:[%s2215_s23 + $0x1e0] sm:$0xf]  ;;  %v1650_v26 = vor.u32 %v1975_v24, %v1649_v23  ;;  %v1991_v27 = vld [vmem:[%s2215_s23 + $0x1e4] sm:$0xf0]  ;;  %v1941_v29 = vld [vmem:[%s2215_s23 + $0x54] sm:$0xf0] }
  0x2d   : > { %812 = vmatpush.bf16.msra.mxu3 %v1722_v17  ;;  %v1714_v30 = vor.u32 %v1991_v27, %v1713_v25  ;;  %v1577_v31 = vld [vmem:[%s2215_s23 + $0xd0] sm:$0xf]  ;;  %v1957_v32 = vld [vmem:[%s2215_s23 + $0xd4] sm:$0xf0]  ;;  %v1514_v34 = vor.u32 %v1941_v29, %v1513_v28  ;;  %v1505_v40 = vld [vmem:[%s2215_s23 + $0x40] sm:$0xf] }
  0x2e   : > { %v1641_v33 = vld [vmem:[%s2215_s23 + $0x150] sm:$0xf]  ;;  %771 = vmatpush.bf16.msra.mxu0 %v1522_v21  ;;  %v1973_v35 = vld [vmem:[%s2215_s23 + $0x154] sm:$0xf0]  ;;  %v1578_v38 = vor.u32 %v1957_v32, %v1577_v31  ;;  %v1939_v41 = vld [vmem:[%s2215_s23 + $0x44] sm:$0xf0] }
  0x2f   : > { %v1705_v36 = vld [vmem:[%s2215_s23 + $0x1d0] sm:$0xf]  ;;  %v1989_v37 = vld [vmem:[%s2215_s23 + $0x1d4] sm:$0xf0]  ;;  %785 = vmatpush.bf16.msra.mxu1 %v1586_v22  ;;  %v1642_v39 = vor.u32 %v1973_v35, %v1641_v33  ;;  %v1569_v42 = vld [vmem:[%s2215_s23 + $0xc0] sm:$0xf]  ;;  %v1506_v49 = vor.u32 %v1939_v41, %v1505_v40 }
  0x30   : > { %799 = vmatpush.bf16.msra.mxu2 %v1650_v26  ;;  %v1706_v43 = vor.u32 %v1989_v37, %v1705_v36  ;;  %v1955_v44 = vld [vmem:[%s2215_s23 + $0xc4] sm:$0xf0]  ;;  %v1633_v45 = vld [vmem:[%s2215_s23 + $0x140] sm:$0xf]  ;;  %v1497_v52 = vld [vmem:[%s2215_s23 + $0x30] sm:$0xf] }
  0x31   : > { %813 = vmatpush.bf16.msra.mxu3 %v1714_v30  ;;  %v1971_v46 = vld [vmem:[%s2215_s23 + $0x144] sm:$0xf0]  ;;  %v1697_v47 = vld [vmem:[%s2215_s23 + $0x1c0] sm:$0xf]  ;;  %v1570_v50 = vor.u32 %v1955_v44, %v1569_v42  ;;  %v1937_v53 = vld [vmem:[%s2215_s23 + $0x34] sm:$0xf0] }
  0x32   : > { %v1987_v48 = vld [vmem:[%s2215_s23 + $0x1c4] sm:$0xf0]  ;;  %772 = vmatpush.bf16.msra.mxu0 %v1514_v34  ;;  %v1634_v51 = vor.u32 %v1971_v46, %v1633_v45  ;;  %v1561_v54 = vld [vmem:[%s2215_s23 + $0xb0] sm:$0xf]  ;;  %v1953_v56 = vld [vmem:[%s2215_s23 + $0xb4] sm:$0xf0]  ;;  %v1498_v61 = vor.u32 %v1937_v53, %v1497_v52 }
  0x33   : > { %786 = vmatpush.bf16.msra.mxu1 %v1578_v38  ;;  %v1698_v55 = vor.u32 %v1987_v48, %v1697_v47  ;;  %v1625_v57 = vld [vmem:[%s2215_s23 + $0x130] sm:$0xf]  ;;  %v1969_v58 = vld [vmem:[%s2215_s23 + $0x134] sm:$0xf0]  ;;  %v1562_v62 = vor.u32 %v1953_v56, %v1561_v54  ;;  %v1489_v0 = vld [vmem:[%s2215_s23 + $0x20] sm:$0xf] }
  0x34   : > { %800 = vmatpush.bf16.msra.mxu2 %v1642_v39  ;;  %v1689_v59 = vld [vmem:[%s2215_s23 + $0x1b0] sm:$0xf]  ;;  %v1985_v60 = vld [vmem:[%s2215_s23 + $0x1b4] sm:$0xf0]  ;;  %v1626_v63 = vor.u32 %v1969_v58, %v1625_v57  ;;  %v1935_v1 = vld [vmem:[%s2215_s23 + $0x24] sm:$0xf0] }
  0x35   : > { %814 = vmatpush.bf16.msra.mxu3 %v1706_v43  ;;  %v1553_v2 = vld [vmem:[%s2215_s23 + $0xa0] sm:$0xf]  ;;  %v1690_v3 = vor.u32 %v1985_v60, %v1689_v59  ;;  %v1951_v4 = vld [vmem:[%s2215_s23 + $0xa4] sm:$0xf0]  ;;  %v1490_v9 = vor.u32 %v1935_v1, %v1489_v0  ;;  %v1481_v12 = vld [vmem:[%s2215_s23 + $0x10] sm:$0xf] }
  0x36   : > { %773 = vmatpush.bf16.msra.mxu0 %v1506_v49  ;;  %v1617_v5 = vld [vmem:[%s2215_s23 + $0x120] sm:$0xf]  ;;  %v1967_v6 = vld [vmem:[%s2215_s23 + $0x124] sm:$0xf0]  ;;  %v1554_v10 = vor.u32 %v1951_v4, %v1553_v2  ;;  %v1933_v13 = vld [vmem:[%s2215_s23 + $0x14] sm:$0xf0] }
  0x37   : > { %787 = vmatpush.bf16.msra.mxu1 %v1570_v50  ;;  %v1681_v7 = vld [vmem:[%s2215_s23 + $0x1a0] sm:$0xf]  ;;  %v1983_v8 = vld [vmem:[%s2215_s23 + $0x1a4] sm:$0xf0]  ;;  %v1618_v11 = vor.u32 %v1967_v6, %v1617_v5  ;;  %v1545_v14 = vld [vmem:[%s2215_s23 + $0x90] sm:$0xf]  ;;  %v1482_v22 = vor.u32 %v1933_v13, %v1481_v12 }
  0x38   : > { %801 = vmatpush.bf16.msra.mxu2 %v1634_v51  ;;  %v1682_v15 = vor.u32 %v1983_v8, %v1681_v7  ;;  %v1949_v16 = vld [vmem:[%s2215_s23 + $0x94] sm:$0xf0]  ;;  %v1609_v17 = vld [vmem:[%s2215_s23 + $0x110] sm:$0xf]  ;;  %v1473_v21 = vld [vmem:[%s2215_s23] sm:$0xf] }
  0x39   : > { %815 = vmatpush.bf16.msra.mxu3 %v1698_v55  ;;  %v1965_v18 = vld [vmem:[%s2215_s23 + $0x114] sm:$0xf0]  ;;  %v1673_v19 = vld [vmem:[%s2215_s23 + $0x190] sm:$0xf]  ;;  %v1931_v23 = vld [vmem:[%s2215_s23 + $0x4] sm:$0xf0]  ;;  %v1546_v26 = vor.u32 %v1949_v16, %v1545_v14 }
  0x3a   : > { %774 = vmatpush.bf16.msra.mxu0 %v1498_v61  ;;  %v1981_v20 = vld [vmem:[%s2215_s23 + $0x194] sm:$0xf0]  ;;  %v1537_v24 = vld [vmem:[%s2215_s23 + $0x80] sm:$0xf]  ;;  %v1947_v25 = vld [vmem:[%s2215_s23 + $0x84] sm:$0xf0]  ;;  %v1610_v27 = vor.u32 %v1965_v18, %v1609_v17  ;;  %v1474_v38 = vor.u32 %v1931_v23, %v1473_v21 }
  0x3b   : > { %788 = vmatpush.bf16.msra.mxu1 %v1562_v62  ;;  %v1601_v28 = vld [vmem:[%s2215_s23 + $0x100] sm:$0xf]  ;;  %v1963_v29 = vld [vmem:[%s2215_s23 + $0x104] sm:$0xf0]  ;;  %v1674_v31 = vor.u32 %v1981_v20, %v1673_v19  ;;  %v1944_v33 = vld [vmem:[%s2215_s23 + $0x74] sm:$0xf]  ;;  %v1538_v42 = vor.u32 %v1947_v25, %v1537_v24 }
  0x3c   : > { %802 = vmatpush.bf16.msra.mxu2 %v1626_v63  ;;  %v1665_v30 = vld [vmem:[%s2215_s23 + $0x180] sm:$0xf]  ;;  %v1979_v32 = vld [vmem:[%s2215_s23 + $0x184] sm:$0xf0]  ;;  %v1531_v34 = vld [vmem:[%s2215_s23 + $0x78] sm:$0xf0]  ;;  %v1602_v43 = vor.u32 %v1963_v29, %v1601_v28 }
  0x3d   : > { %816 = vmatpush.bf16.msra.mxu3 %v1690_v3  ;;  %v1960_v35 = vld [vmem:[%s2215_s23 + $0xf4] sm:$0xf]  ;;  %v1595_v36 = vld [vmem:[%s2215_s23 + $0xf8] sm:$0xf0]  ;;  %v1942_v44 = vld [vmem:[%s2215_s23 + $0x64] sm:$0xf]  ;;  %v1666_v48 = vor.u32 %v1979_v32, %v1665_v30  ;;  %v1534_v49 = vor.u32 %v1944_v33, %v1531_v34 }
  0x3e   : > { %775 = vmatpush.bf16.msra.mxu0 %v1490_v9  ;;  %v1976_v37 = vld [vmem:[%s2215_s23 + $0x174] sm:$0xf]  ;;  %v1659_v39 = vld [vmem:[%s2215_s23 + $0x178] sm:$0xf0]  ;;  %v1523_v45 = vld [vmem:[%s2215_s23 + $0x68] sm:$0xf0]  ;;  %v1598_v54 = vor.u32 %v1960_v35, %v1595_v36 }
  0x3f   : > { %789 = vmatpush.bf16.msra.mxu1 %v1554_v10  ;;  %v1992_v40 = vld [vmem:[%s2215_s23 + $0x1f4] sm:$0xf]  ;;  %v1723_v41 = vld [vmem:[%s2215_s23 + $0x1f8] sm:$0xf0]  ;;  %v1465_v46 = vld [vmem:[%s2217_s30 + $0x8] sm:$0xf]  ;;  %v1662_v55 = vor.u32 %v1976_v37, %v1659_v39  ;;  %v1526_v4 = vor.u32 %v1942_v44, %v1523_v45 }
  0x40   : > { %803 = vmatpush.bf16.msra.mxu2 %v1618_v11  ;;  %v1929_v47 = vld [vmem:[%s2217_s30 + $0x14] sm:$0xf0]  ;;  %v1958_v50 = vld [vmem:[%s2215_s23 + $0xe4] sm:$0xf]  ;;  %v1587_v51 = vld [vmem:[%s2215_s23 + $0xe8] sm:$0xf0]  ;;  %v1726_v59 = vor.u32 %v1992_v40, %v1723_v41 }
  0x41   : > { %817 = vmatpush.bf16.msra.mxu3 %v1682_v15  ;;  %v1974_v52 = vld [vmem:[%s2215_s23 + $0x164] sm:$0xf]  ;;  %v1651_v53 = vld [vmem:[%s2215_s23 + $0x168] sm:$0xf0]  ;;  %v1467_v57 = vld [vmem:[%s2217_s30 + $0x18] sm:$0xf0]  ;;  %v2303_v60 = vor.u32 %v1929_v47, %v1465_v46  ;;  %v1590_v6 = vor.u32 %v1958_v50, %v1587_v51 }
  0x42   : > { %776 = vmatpush.bf16.msra.mxu0 %v1482_v22  ;;  %v1927_v56 = vld [vmem:[%s2217_s30 + $0xc] sm:$0xf]  ;;  %v1457_v58 = vld [vmem:[%s2217_s30] sm:$0xf]  ;;  %v1928_v61 = vld [vmem:[%s2217_s30 + $0xc] sm:$0xf0]  ;;  %v1654_v7 = vor.u32 %v1974_v52, %v1651_v53 }
  0x43   : > { %790 = vmatpush.bf16.msra.mxu1 %v1546_v26  ;;  %v1926_v62 = vld [vmem:[%s2217_s30 + $0x4] sm:$0xf]  ;;  %v1459_v63 = vld [vmem:[%s2217_s30 + $0x10] sm:$0xf0]  ;;  %v1715_v1 = vld [vmem:[%s2215_s23 + $0x1e8] sm:$0xf0]  ;;  %v2310_v2 = vor.u32 %v1927_v56, %v1467_v57  ;;  %v2312_v3 = vor.u32 %v1928_v61, %v1457_v58 }
  0x44   : > { %804 = vmatpush.bf16.msra.mxu2 %v1610_v27  ;;  %v1990_v0 = vld [vmem:[%s2215_s23 + $0x1e4] sm:$0xf]  ;;  %v2314_v5 = vor.u32 %v1926_v62, %v1459_v63  ;;  %v1940_v8 = vld [vmem:[%s2215_s23 + $0x54] sm:$0xf]  ;;  %v1515_v9 = vld [vmem:[%s2215_s23 + $0x58] sm:$0xf0] }
  0x45   : > { %818 = vmatpush.bf16.msra.mxu3 %v1674_v31  ;;  %v1956_v10 = vld [vmem:[%s2215_s23 + $0xd4] sm:$0xf]  ;;  %v1718_v11 = vor.u32 %v1990_v0, %v1715_v1  ;;  %v1579_v12 = vld [vmem:[%s2215_s23 + $0xd8] sm:$0xf0]  ;;  %v1518_v17 = vor.u32 %v1940_v8, %v1515_v9  ;;  %v1938_v20 = vld [vmem:[%s2215_s23 + $0x44] sm:$0xf] }
  0x46   : > { %777 = vmatpush.bf16.msra.mxu0 %v1474_v38  ;;  %v1972_v13 = vld [vmem:[%s2215_s23 + $0x154] sm:$0xf]  ;;  %v1643_v14 = vld [vmem:[%s2215_s23 + $0x158] sm:$0xf0]  ;;  %v1582_v18 = vor.u32 %v1956_v10, %v1579_v12  ;;  %v1507_v21 = vld [vmem:[%s2215_s23 + $0x48] sm:$0xf0] }
  0x47   : > { %791 = vmatpush.bf16.msra.mxu1 %v1538_v42  ;;  %v1988_v15 = vld [vmem:[%s2215_s23 + $0x1d4] sm:$0xf]  ;;  %v1707_v16 = vld [vmem:[%s2215_s23 + $0x1d8] sm:$0xf0]  ;;  %v1646_v19 = vor.u32 %v1972_v13, %v1643_v14  ;;  %v1954_v22 = vld [vmem:[%s2215_s23 + $0xc4] sm:$0xf]  ;;  %v1510_v29 = vor.u32 %v1938_v20, %v1507_v21 }
  0x48   : > { %805 = vmatpush.bf16.msra.mxu2 %v1602_v43  ;;  %v1710_v23 = vor.u32 %v1988_v15, %v1707_v16  ;;  %v1571_v24 = vld [vmem:[%s2215_s23 + $0xc8] sm:$0xf0]  ;;  %v1970_v25 = vld [vmem:[%s2215_s23 + $0x144] sm:$0xf]  ;;  %v1936_v32 = vld [vmem:[%s2215_s23 + $0x34] sm:$0xf] }
  0x49   : > { %819 = vmatpush.bf16.msra.mxu3 %v1666_v48  ;;  %778 = vmatmul.bf16.vlgmr.msra.gmra.mxu0 %v2312_v3  ;;  %v1635_v26 = vld [vmem:[%s2215_s23 + $0x148] sm:$0xf0]  ;;  %v1986_v27 = vld [vmem:[%s2215_s23 + $0x1c4] sm:$0xf]  ;;  %v1574_v30 = vor.u32 %v1954_v22, %v1571_v24  ;;  %v1499_v33 = vld [vmem:[%s2215_s23 + $0x38] sm:$0xf0] }
  0x4a   : > { %826 = vmatpush.bf16.msrb.mxu0 %v1534_v49  ;;  %792 = vmatmul.bf16.vlgmr.msra.gmra.mxu1 %v2314_v5  ;;  %v1699_v28 = vld [vmem:[%s2215_s23 + $0x1c8] sm:$0xf0]  ;;  %v1638_v31 = vor.u32 %v1970_v25, %v1635_v26  ;;  %v1952_v34 = vld [vmem:[%s2215_s23 + $0xb4] sm:$0xf]  ;;  %v1563_v36 = vld [vmem:[%s2215_s23 + $0xb8] sm:$0xf0]  ;;  %v1502_v41 = vor.u32 %v1936_v32, %v1499_v33 }
  0x4b   : > { %840 = vmatpush.bf16.msrb.mxu1 %v1598_v54  ;;  %806 = vmatmul.bf16.vlgmr.msra.gmra.mxu2 %v2303_v60  ;;  %v1702_v35 = vor.u32 %v1986_v27, %v1699_v28  ;;  %v1968_v37 = vld [vmem:[%s2215_s23 + $0x134] sm:$0xf]  ;;  %v1627_v38 = vld [vmem:[%s2215_s23 + $0x138] sm:$0xf0]  ;;  %v1566_v42 = vor.u32 %v1952_v34, %v1563_v36  ;;  %v1934_v44 = vld [vmem:[%s2215_s23 + $0x24] sm:$0xf] }
  0x4c   : > { %854 = vmatpush.bf16.msrb.mxu2 %v1662_v55  ;;  %820 = vmatmul.bf16.vlgmr.msra.gmra.mxu3 %v2310_v2  ;;  %v1984_v39 = vld [vmem:[%s2215_s23 + $0x1b4] sm:$0xf]  ;;  %v1691_v40 = vld [vmem:[%s2215_s23 + $0x1b8] sm:$0xf0]  ;;  %v1630_v43 = vor.u32 %v1968_v37, %v1627_v38  ;;  %v1491_v45 = vld [vmem:[%s2215_s23 + $0x28] sm:$0xf0] }
  0x4d   : > { %868 = vmatpush.bf16.msrb.mxu3 %v1726_v59  ;;  %v1950_v46 = vld [vmem:[%s2215_s23 + $0xa4] sm:$0xf]  ;;  %v1694_v47 = vor.u32 %v1984_v39, %v1691_v40  ;;  %v1555_v48 = vld [vmem:[%s2215_s23 + $0xa8] sm:$0xf0]  ;;  %v1494_v53 = vor.u32 %v1934_v44, %v1491_v45  ;;  %v1932_v56 = vld [vmem:[%s2215_s23 + $0x14] sm:$0xf] }
  0x4e   : > { %827 = vmatpush.bf16.msrb.mxu0 %v1526_v4  ;;  %v1966_v49 = vld [vmem:[%s2215_s23 + $0x124] sm:$0xf]  ;;  %v1619_v50 = vld [vmem:[%s2215_s23 + $0x128] sm:$0xf0]  ;;  %v1558_v54 = vor.u32 %v1950_v46, %v1555_v48  ;;  %v1483_v57 = vld [vmem:[%s2215_s23 + $0x18] sm:$0xf0] }
  0x4f   : > { %841 = vmatpush.bf16.msrb.mxu1 %v1590_v6  ;;  %v1982_v51 = vld [vmem:[%s2215_s23 + $0x1a4] sm:$0xf]  ;;  %v1683_v52 = vld [vmem:[%s2215_s23 + $0x1a8] sm:$0xf0]  ;;  %v1622_v55 = vor.u32 %v1966_v49, %v1619_v50  ;;  %v1948_v58 = vld [vmem:[%s2215_s23 + $0x94] sm:$0xf]  ;;  %v1486_v4 = vor.u32 %v1932_v56, %v1483_v57 }
  0x50   : > { %855 = vmatpush.bf16.msrb.mxu2 %v1654_v7  ;;  %v1686_v59 = vor.u32 %v1982_v51, %v1683_v52  ;;  %v1547_v61 = vld [vmem:[%s2215_s23 + $0x98] sm:$0xf0]  ;;  %v1964_v62 = vld [vmem:[%s2215_s23 + $0x114] sm:$0xf]  ;;  %v1930_v8 = vld [vmem:[%s2215_s23 + $0x4] sm:$0xf] }
  0x51   : > { %869 = vmatpush.bf16.msrb.mxu3 %v1718_v11  ;;  %v1611_v63 = vld [vmem:[%s2215_s23 + $0x118] sm:$0xf0]  ;;  %v1980_v0 = vld [vmem:[%s2215_s23 + $0x194] sm:$0xf]  ;;  %v1550_v6 = vor.u32 %v1948_v58, %v1547_v61  ;;  %v1475_v9 = vld [vmem:[%s2215_s23 + $0x8] sm:$0xf0] }
  0x52   : > { %828 = vmatpush.bf16.msrb.mxu0 %v1518_v17  ;;  %v1675_v1 = vld [vmem:[%s2215_s23 + $0x198] sm:$0xf0]  ;;  %v1614_v7 = vor.u32 %v1964_v62, %v1611_v63  ;;  %v1946_v10 = vld [vmem:[%s2215_s23 + $0x84] sm:$0xf]  ;;  %v1539_v12 = vld [vmem:[%s2215_s23 + $0x88] sm:$0xf0]  ;;  %v1478_v17 = vor.u32 %v1930_v8, %v1475_v9 }
  0x53   : > { %842 = vmatpush.bf16.msrb.mxu1 %v1582_v18  ;;  %v1678_v11 = vor.u32 %v1980_v0, %v1675_v1  ;;  %v1962_v13 = vld [vmem:[%s2215_s23 + $0x104] sm:$0xf]  ;;  %v1603_v14 = vld [vmem:[%s2215_s23 + $0x108] sm:$0xf0]  ;;  %v1542_v18 = vor.u32 %v1946_v10, %v1539_v12  ;;  %v358_v27 = vld [vmem:[#allocation2 + $0x10] sm:$0xff]  ;;  %p1727_p11 = scmp.ne.s32.totalorder %s2114_s26, 1 }
  0x54   : > { %856 = vmatpush.bf16.msrb.mxu2 %v1646_v19  ;;  %v1978_v15 = vld [vmem:[%s2215_s23 + $0x184] sm:$0xf]  ;;  %v1667_v16 = vld [vmem:[%s2215_s23 + $0x188] sm:$0xf0]  ;;  %v1606_v19 = vor.u32 %v1962_v13, %v1603_v14  ;;  %v360_v34 = vld [vmem:[#allocation2 + $0x18] sm:$0xff] }
  0x55   : > { %870 = vmatpush.bf16.msrb.mxu3 %v1710_v23  ;;  %v1670_v20 = vor.u32 %v1978_v15, %v1667_v16  ;;  %v361_v49 = vld [vmem:[#allocation2 + $0x8] sm:$0xff] }
  0x56   : > { %829 = vmatpush.bf16.msrb.mxu0 %v1510_v29 }
  0x57   : > { %843 = vmatpush.bf16.msrb.mxu1 %v1574_v30 }
  0x58   : > { %857 = vmatpush.bf16.msrb.mxu2 %v1638_v31 }
  0x59   : > { %871 = vmatpush.bf16.msrb.mxu3 %v1702_v35 }
  0x5a   : > { %830 = vmatpush.bf16.msrb.mxu0 %v1502_v41  ;;  %v359_v41 = vld [vmem:[#allocation2] sm:$0xff] }
  0x5b   : > { %844 = vmatpush.bf16.msrb.mxu1 %v1566_v42 }
  0x5c   : > { %858 = vmatpush.bf16.msrb.mxu2 %v1630_v43 }
  0x5d   : > { %872 = vmatpush.bf16.msrb.mxu3 %v1694_v47 }
  0x5e   : > { %831 = vmatpush.bf16.msrb.mxu0 %v1494_v53 }
  0x5f   : > { %845 = vmatpush.bf16.msrb.mxu1 %v1558_v54 }
  0x60   : > { %859 = vmatpush.bf16.msrb.mxu2 %v1622_v55 }
  0x61   : > { %873 = vmatpush.bf16.msrb.mxu3 %v1686_v59 }
  0x62   : > { %832 = vmatpush.bf16.msrb.mxu0 %v1486_v4 }
  0x63   : > { %846 = vmatpush.bf16.msrb.mxu1 %v1550_v6 }
  0x64   : > { %860 = vmatpush.bf16.msrb.mxu2 %v1614_v7 }
  0x65   : > { %874 = vmatpush.bf16.msrb.mxu3 %v1678_v11 }
  0x66   : > { %833 = vmatpush.bf16.msrb.mxu0 %v1478_v17 }
  0x67   : > { %847 = vmatpush.bf16.msrb.mxu1 %v1542_v18 }
  0x68   : > { %861 = vmatpush.bf16.msrb.mxu2 %v1606_v19 }
  0x69   : > { %875 = vmatpush.bf16.msrb.mxu3 %v1670_v20  ;;  %834 = vmatmul.bf16.vlgmr.msrb.gmra.mxu0 %v2312_v3 }
  0x6a   : > { %848 = vmatmul.bf16.vlgmr.msrb.gmra.mxu1 %v2314_v5 }
  0x6b   : > { %862 = vmatmul.bf16.vlgmr.msrb.gmra.mxu2 %v2303_v60 }
  0x6c   : > { %876 = vmatmul.bf16.vlgmr.msrb.gmra.mxu3 %v2310_v2 }
  0xc6   : > { %v779_v21 = vpop.f32.mrf.mxu0 }
  0xc7   : > { %v793_v22 = vpop.f32.mrf.mxu1 }
  0xc8   : > { %v794_v23 = vadd.f32 %v793_v22, %v779_v21 }
  0xce   : > { %v807_v24 = vpop.f32.mrf.mxu2  ;;  %v781_v29 = vpop.f32.mrf.mxu0 }
  0xcf   : > { %v808_v25 = vadd.f32 %v807_v24, %v794_v23  ;;  %v821_v26 = vpop.f32.mrf.mxu3  ;;  %v795_v30 = vpop.f32.mrf.mxu1 }
  0xd0   : > { %v796_v32 = vadd.f32 %v795_v30, %v781_v29 }
  0xd1   : > { %v822_v28 = vadd.f32 %v821_v26, %v808_v25 }
  0xd3   : > { %v882_v31 = vadd.f32 %v822_v28, %v358_v27 }
  0xd5   : > { %886 = vst [vmem:[#allocation2 + $0x10] sm:$0xff] %v882_v31 }
  0xd6   : > { %v809_v3 = vpop.f32.mrf.mxu2 }
  0xd7   : > { %v810_v33 = vadd.f32 %v809_v3, %v796_v32  ;;  %v823_v5 = vpop.f32.mrf.mxu3 }
  0xd9   : > { %v824_v60 = vadd.f32 %v823_v5, %v810_v33 }
  0xdb   : > { %v884_v35 = vadd.f32 %v824_v60, %v360_v34 }
  0xdd   : > { %888 = vst [vmem:[#allocation2 + $0x18] sm:$0xff] %v884_v35 }
  0xe6   : > { %v835_v2 = vpop.f32.mrf.mxu0 }
  0xe7   : > { %v849_v36 = vpop.f32.mrf.mxu1 }
  0xe8   : > { %v850_v37 = vadd.f32 %v849_v36, %v835_v2 }
  0xee   : > { %v863_v38 = vpop.f32.mrf.mxu2  ;;  %v837_v43 = vpop.f32.mrf.mxu0 }
  0xef   : > { %v864_v39 = vadd.f32 %v863_v38, %v850_v37  ;;  %v877_v40 = vpop.f32.mrf.mxu3  ;;  %v851_v44 = vpop.f32.mrf.mxu1 }
  0xf0   : > { %v852_v46 = vadd.f32 %v851_v44, %v837_v43 }
  0xf1   : > { %v878_v42 = vadd.f32 %v877_v40, %v864_v39 }
  0xf3   : > { %v883_v45 = vadd.f32 %v878_v42, %v359_v41 }
  0xf5   : > { %887 = vst [vmem:[#allocation2] sm:$0xff] %v883_v45 }
  0xf6   : > { %v865_v47 = vpop.f32.mrf.mxu2 }
  0xf7   : > { %v866_v48 = vadd.f32 %v865_v47, %v852_v46  ;;  %v879_v50 = vpop.f32.mrf.mxu3 }
  0xf9   : > { %v880_v51 = vadd.f32 %v879_v50, %v866_v48  ;;  %893 = sbr.rel (%p1727_p11) target bundleno = 578 (0x242), region = 79 }
  0xfb   : > { %v885_v52 = vadd.f32 %v880_v51, %v361_v49 }
  0xfd   : > { %889 = vst [vmem:[#allocation2 + $0x8] sm:$0xff] %v885_v52 }
  0xfe   : > { %v1786_v53 = vld [vmem:[%s2646_s3 + $0x70] sm:$0xf]  ;;  %v2009_v54 = vld [vmem:[%s2646_s3 + $0x74] sm:$0xf0]  ;;  %v2008_v58 = vld [vmem:[%s2646_s3 + $0x74] sm:$0xf] }
  0xff   : > { %v1850_v55 = vld [vmem:[%s2646_s3 + $0xf0] sm:$0xf]  ;;  %v1787_v56 = vor.u32 %v2009_v54, %v1786_v53  ;;  %v2025_v57 = vld [vmem:[%s2646_s3 + $0xf4] sm:$0xf0]  ;;  %v1788_v59 = vld [vmem:[%s2646_s3 + $0x78] sm:$0xf0] }
 0x100   : > { %v1851_v61 = vor.u32 %v2025_v57, %v1850_v55  ;;  %v1791_v62 = vor.u32 %v2008_v58, %v1788_v59  ;;  %v2024_v63 = vld [vmem:[%s2646_s3 + $0xf4] sm:$0xf]  ;;  %v1852_v0 = vld [vmem:[%s2646_s3 + $0xf8] sm:$0xf0]  ;;  %v1778_v1 = vld [vmem:[%s2646_s3 + $0x60] sm:$0xf] }
 0x101   : > { %1124 = vmatpush.bf16.msra.mxu0 %v1787_v56  ;;  %v1855_v4 = vor.u32 %v2024_v63, %v1852_v0  ;;  %v2007_v6 = vld [vmem:[%s2646_s3 + $0x64] sm:$0xf0]  ;;  %v1842_v7 = vld [vmem:[%s2646_s3 + $0xe0] sm:$0xf]  ;;  %v2006_v11 = vld [vmem:[%s2646_s3 + $0x64] sm:$0xf] }
 0x102   : > { %v2023_v8 = vld [vmem:[%s2646_s3 + $0xe4] sm:$0xf0]  ;;  %1138 = vmatpush.bf16.msra.mxu1 %v1851_v61  ;;  %1152 = vmatpush.bf16.msra.mxu2 %v1791_v62  ;;  %v1779_v9 = vor.u32 %v2007_v6, %v1778_v1  ;;  %v1780_v12 = vld [vmem:[%s2646_s3 + $0x68] sm:$0xf0]  ;;  %v2022_v13 = vld [vmem:[%s2646_s3 + $0xe4] sm:$0xf] }
 0x103   : > { %v1843_v10 = vor.u32 %v2023_v8, %v1842_v7  ;;  %1166 = vmatpush.bf16.msra.mxu3 %v1855_v4  ;;  %v1783_v14 = vor.u32 %v2006_v11, %v1780_v12  ;;  %v1844_v15 = vld [vmem:[%s2646_s3 + $0xe8] sm:$0xf0]  ;;  %v1770_v16 = vld [vmem:[%s2646_s3 + $0x50] sm:$0xf]  ;;  %v2005_v17 = vld [vmem:[%s2646_s3 + $0x54] sm:$0xf0] }
 0x104   : > { %v1847_v18 = vor.u32 %v2022_v13, %v1844_v15  ;;  %v1834_v19 = vld [vmem:[%s2646_s3 + $0xd0] sm:$0xf]  ;;  %v2021_v20 = vld [vmem:[%s2646_s3 + $0xd4] sm:$0xf0]  ;;  %v2004_v21 = vld [vmem:[%s2646_s3 + $0x54] sm:$0xf]  ;;  %v1771_v22 = vor.u32 %v2005_v17, %v1770_v16 }
 0x105   : > { %1125 = vmatpush.bf16.msra.mxu0 %v1779_v9  ;;  %v1772_v23 = vld [vmem:[%s2646_s3 + $0x58] sm:$0xf0]  ;;  %v2020_v24 = vld [vmem:[%s2646_s3 + $0xd4] sm:$0xf]  ;;  %v1835_v26 = vor.u32 %v2021_v20, %v1834_v19  ;;  %v1762_v28 = vld [vmem:[%s2646_s3 + $0x40] sm:$0xf] }
 0x106   : > { %v1836_v25 = vld [vmem:[%s2646_s3 + $0xd8] sm:$0xf0]  ;;  %1139 = vmatpush.bf16.msra.mxu1 %v1843_v10  ;;  %1153 = vmatpush.bf16.msra.mxu2 %v1783_v14  ;;  %v1775_v27 = vor.u32 %v2004_v21, %v1772_v23  ;;  %v2003_v29 = vld [vmem:[%s2646_s3 + $0x44] sm:$0xf0]  ;;  %v1826_v30 = vld [vmem:[%s2646_s3 + $0xc0] sm:$0xf] }
 0x107   : > { %1167 = vmatpush.bf16.msra.mxu3 %v1847_v18  ;;  %v1839_v31 = vor.u32 %v2020_v24, %v1836_v25  ;;  %v2019_v32 = vld [vmem:[%s2646_s3 + $0xc4] sm:$0xf0]  ;;  %v2002_v3 = vld [vmem:[%s2646_s3 + $0x44] sm:$0xf]  ;;  %v1764_v33 = vld [vmem:[%s2646_s3 + $0x48] sm:$0xf0]  ;;  %v1763_v60 = vor.u32 %v2003_v29, %v1762_v28 }
 0x108   : > { %v2018_v5 = vld [vmem:[%s2646_s3 + $0xc4] sm:$0xf]  ;;  %v1828_v34 = vld [vmem:[%s2646_s3 + $0xc8] sm:$0xf0]  ;;  %v1827_v35 = vor.u32 %v2019_v32, %v1826_v30  ;;  %v1767_v2 = vor.u32 %v2002_v3, %v1764_v33  ;;  %v1754_v36 = vld [vmem:[%s2646_s3 + $0x30] sm:$0xf] }
 0x109   : > { %1126 = vmatpush.bf16.msra.mxu0 %v1771_v22  ;;  %v2001_v37 = vld [vmem:[%s2646_s3 + $0x34] sm:$0xf0]  ;;  %v1818_v38 = vld [vmem:[%s2646_s3 + $0xb0] sm:$0xf]  ;;  %v1831_v39 = vor.u32 %v2018_v5, %v1828_v34  ;;  %v2000_v41 = vld [vmem:[%s2646_s3 + $0x34] sm:$0xf] }
 0x10a   : > { %1140 = vmatpush.bf16.msra.mxu1 %v1835_v26  ;;  %1154 = vmatpush.bf16.msra.mxu2 %v1775_v27  ;;  %v2017_v40 = vld [vmem:[%s2646_s3 + $0xb4] sm:$0xf0]  ;;  %v1756_v42 = vld [vmem:[%s2646_s3 + $0x38] sm:$0xf0]  ;;  %v2016_v43 = vld [vmem:[%s2646_s3 + $0xb4] sm:$0xf]  ;;  %v1755_v45 = vor.u32 %v2001_v37, %v1754_v36 }
 0x10b   : > { %1168 = vmatpush.bf16.msra.mxu3 %v1839_v31  ;;  %v1820_v44 = vld [vmem:[%s2646_s3 + $0xb8] sm:$0xf0]  ;;  %v1746_v46 = vld [vmem:[%s2646_s3 + $0x20] sm:$0xf]  ;;  %v1819_v47 = vor.u32 %v2017_v40, %v1818_v38  ;;  %v1759_v48 = vor.u32 %v2000_v41, %v1756_v42  ;;  %v1999_v49 = vld [vmem:[%s2646_s3 + $0x24] sm:$0xf0] }
 0x10c   : > { %v1810_v50 = vld [vmem:[%s2646_s3 + $0xa0] sm:$0xf]  ;;  %v2015_v51 = vld [vmem:[%s2646_s3 + $0xa4] sm:$0xf0]  ;;  %v1823_v52 = vor.u32 %v2016_v43, %v1820_v44  ;;  %v1998_v53 = vld [vmem:[%s2646_s3 + $0x24] sm:$0xf]  ;;  %v1747_v59 = vor.u32 %v1999_v49, %v1746_v46 }
 0x10d   : > { %1127 = vmatpush.bf16.msra.mxu0 %v1763_v60  ;;  %v1748_v54 = vld [vmem:[%s2646_s3 + $0x28] sm:$0xf0]  ;;  %v2014_v55 = vld [vmem:[%s2646_s3 + $0xa4] sm:$0xf]  ;;  %v1738_v57 = vld [vmem:[%s2646_s3 + $0x10] sm:$0xf]  ;;  %v1811_v0 = vor.u32 %v2015_v51, %v1810_v50 }
 0x10e   : > { %1141 = vmatpush.bf16.msra.mxu1 %v1827_v35  ;;  %1155 = vmatpush.bf16.msra.mxu2 %v1767_v2  ;;  %v1812_v56 = vld [vmem:[%s2646_s3 + $0xa8] sm:$0xf0]  ;;  %v1997_v58 = vld [vmem:[%s2646_s3 + $0x14] sm:$0xf0]  ;;  %v1802_v61 = vld [vmem:[%s2646_s3 + $0x90] sm:$0xf]  ;;  %v1751_v1 = vor.u32 %v1998_v53, %v1748_v54 }
 0x10f   : > { %1169 = vmatpush.bf16.msra.mxu3 %v1831_v39  ;;  %v2013_v62 = vld [vmem:[%s2646_s3 + $0x94] sm:$0xf0]  ;;  %v1996_v63 = vld [vmem:[%s2646_s3 + $0x14] sm:$0xf]  ;;  %v1740_v4 = vld [vmem:[%s2646_s3 + $0x18] sm:$0xf0]  ;;  %v1815_v8 = vor.u32 %v2014_v55, %v1812_v56  ;;  %v1739_v18 = vor.u32 %v1997_v58, %v1738_v57 }
 0x110   : > { %v2012_v6 = vld [vmem:[%s2646_s3 + $0x94] sm:$0xf]  ;;  %v1804_v7 = vld [vmem:[%s2646_s3 + $0x98] sm:$0xf0]  ;;  %v1730_v9 = vld [vmem:[%s2646_s3] sm:$0xf]  ;;  %v1803_v23 = vor.u32 %v2013_v62, %v1802_v61  ;;  %v1743_v24 = vor.u32 %v1996_v63, %v1740_v4 }
 0x111   : > { %1128 = vmatpush.bf16.msra.mxu0 %v1755_v45  ;;  %v1995_v10 = vld [vmem:[%s2646_s3 + $0x4] sm:$0xf0]  ;;  %v1794_v11 = vld [vmem:[%s2646_s3 + $0x80] sm:$0xf]  ;;  %v894_v13 = vld [vmem:[#allocation2 + $0x10] sm:$0xff]  ;;  %v1807_v25 = vor.u32 %v2012_v6, %v1804_v7 }
 0x112   : > { %1142 = vmatpush.bf16.msra.mxu1 %v1819_v47  ;;  %1156 = vmatpush.bf16.msra.mxu2 %v1759_v48  ;;  %v2011_v12 = vld [vmem:[%s2646_s3 + $0x84] sm:$0xf0]  ;;  %v896_v14 = vld [vmem:[#allocation2 + $0x18] sm:$0xff]  ;;  %v898_v15 = vld [vmem:[%s2645_s2] sm:$0x3]  ;;  %v1731_v30 = vor.u32 %v1995_v10, %v1730_v9 }
 0x113   : > { %1170 = vmatpush.bf16.msra.mxu3 %v1823_v52  ;;  %v895_v16 = vld [vmem:[#allocation2] sm:$0xff]  ;;  %v897_v17 = vld [vmem:[#allocation2 + $0x8] sm:$0xff]  ;;  %v900_v21 = vperm.slane %v898_v15, 0  ;;  %v901_v22 = vperm.slane %v898_v15, 1  ;;  %v1795_v31 = vor.u32 %v2011_v12, %v1794_v11  ;;  %v2033_v38 = vld [vmem:[%s2648_s5 + $0x38] sm:$0xff] }
 0x114   : > { %v1994_v19 = vld [vmem:[%s2646_s3 + $0x4] sm:$0xf]  ;;  %v1732_v20 = vld [vmem:[%s2646_s3 + $0x8] sm:$0xf0]  ;;  %v2041_v43 = vld [vmem:[%s2648_s5 + $0x78] sm:$0xff] }
 0x115   : > { %1129 = vmatpush.bf16.msra.mxu0 %v1747_v59  ;;  %v904_v26 = vadd.f32 %v900_v21, %v894_v13  ;;  %v906_v27 = vadd.f32 %v900_v21, %v896_v14  ;;  %v905_v28 = vadd.f32 %v901_v22, %v895_v16  ;;  %v907_v29 = vadd.f32 %v901_v22, %v897_v17  ;;  %v2010_v3 = vld [vmem:[%s2646_s3 + $0x84] sm:$0xf]  ;;  %v1796_v33 = vld [vmem:[%s2646_s3 + $0x88] sm:$0xf0]  ;;  %v2032_v48 = vld [vmem:[%s2648_s5 + $0x30] sm:$0xff] }
 0x116   : > { %1143 = vmatpush.bf16.msra.mxu1 %v1811_v0  ;;  %1157 = vmatpush.bf16.msra.mxu2 %v1751_v1  ;;  %v1735_v32 = vor.u32 %v1994_v19, %v1732_v20  ;;  %v1799_v2 = vor.u32 %v2010_v3, %v1796_v33  ;;  %v2040_v49 = vld [vmem:[%s2648_s5 + $0x70] sm:$0xff]  ;;  %v2031_v50 = vld [vmem:[%s2648_s5 + $0x28] sm:$0xff]  ;;  %v2030_v51 = vld [vmem:[%s2648_s5 + $0x20] sm:$0xff] }
 0x117   : > { %1171 = vmatpush.bf16.msra.mxu3 %v1815_v8  ;;  %vm908_vm0 = vcmp.ge.f32.partialorder %v904_v26, 0.0  ;;  %vm910_vm1 = vcmp.ge.f32.partialorder %v906_v27, 0.0  ;;  %v912_v5 = vmul.f32 0.2, %v904_v26  ;;  %v914_v34 = vmul.f32 0.2, %v906_v27 }
 0x118   : > { %vm909_vm2 = vcmp.ge.f32.partialorder %v905_v28, 0.0  ;;  %vm911_vm3 = vcmp.ge.f32.partialorder %v907_v29, 0.0  ;;  %v913_v60 = vmul.f32 0.2, %v905_v28  ;;  %v915_v35 = vmul.f32 0.2, %v907_v29 }
 0x119   : > { %1130 = vmatpush.bf16.msra.mxu0 %v1739_v18  ;;  %v916_v36 = vsel %vm908_vm0, %v904_v26, %v912_v5  ;;  %v918_v37 = vsel %vm910_vm1, %v906_v27, %v914_v34  ;;  %v2039_v52 = vld [vmem:[%s2648_s5 + $0x68] sm:$0xff]  ;;  %v2029_v53 = vld [vmem:[%s2648_s5 + $0x18] sm:$0xff]  ;;  %v2038_v54 = vld [vmem:[%s2648_s5 + $0x60] sm:$0xff] }
 0x11a   : > { %1144 = vmatpush.bf16.msra.mxu1 %v1803_v23  ;;  %1158 = vmatpush.bf16.msra.mxu2 %v1743_v24  ;;  %v920_v39 = vmul.f32 1.4142135, %v916_v36  ;;  %v922_v40 = vmul.f32 1.4142135, %v918_v37  ;;  %v917_v41 = vsel %vm909_vm2, %v905_v28, %v913_v60  ;;  %v919_v42 = vsel %vm911_vm3, %v907_v29, %v915_v35  ;;  %v2028_v55 = vld [vmem:[%s2648_s5 + $0x10] sm:$0xff]  ;;  %v2037_v56 = vld [vmem:[%s2648_s5 + $0x58] sm:$0xff] }
 0x11b   : > { %1172 = vmatpush.bf16.msra.mxu3 %v1807_v25  ;;  %v921_v44 = vmul.f32 1.4142135, %v917_v41  ;;  %v923_v45 = vmul.f32 1.4142135, %v919_v42  ;;  %v2027_v57 = vld [vmem:[%s2648_s5 + $0x8] sm:$0xff]  ;;  %v2036_v58 = vld [vmem:[%s2648_s5 + $0x50] sm:$0xff] }
 0x11c   : > { %v957_v46 = vpack.c.bf16 %v922_v40, %v920_v39  ;;  %v2026_v59 = vld [vmem:[%s2648_s5] sm:$0xff]  ;;  %v2035_v61 = vld [vmem:[%s2648_s5 + $0x48] sm:$0xff] }
 0x11d   : > { %1131 = vmatpush.bf16.msra.mxu0 %v1731_v30  ;;  %v958_v47 = vpack.c.bf16 %v923_v45, %v921_v44  ;;  %v2034_v62 = vld [vmem:[%s2648_s5 + $0x40] sm:$0xff] }
 0x11e   : > { %1145 = vmatpush.bf16.msra.mxu1 %v1795_v31  ;;  %1159 = vmatpush.bf16.msra.mxu2 %v1735_v32  ;;  %v956_v63 = vld [vmem:[%s2647_s4] sm:$0x3] }
 0x11f   : > { %1173 = vmatpush.bf16.msra.mxu3 %v1799_v2  ;;  %v960_v0 = vperm.slane %v956_v63, 0  ;;  %v961_v7 = vperm.slane %v956_v63, 1  ;;  %v2083_v34 = vld [vmem:[%s2649_s6] ss:$0 sm:$0xff] }
 0x120   : > { %1132 = vmatmul.bf16.vlgmr.msra.gmra.mxu0 %v957_v46 }
 0x121   : > { %1330 = vmatpush.bf16.msrb.mxu0 %v2033_v38  ;;  %1146 = vmatmul.bf16.vlgmr.msra.gmra.mxu1 %v958_v47 }
 0x122   : > { %1344 = vmatpush.bf16.msrb.mxu1 %v2041_v43  ;;  %1160 = vmatmul.bf16.vlgmr.msra.gmra.mxu2 %v957_v46 }
 0x123   : > { %1174 = vmatmul.bf16.vlgmr.msra.gmra.mxu3 %v958_v47 }
 0x125   : > { %1331 = vmatpush.bf16.msrb.mxu0 %v2032_v48 }
 0x126   : > { %1345 = vmatpush.bf16.msrb.mxu1 %v2040_v49 }
 0x129   : > { %1332 = vmatpush.bf16.msrb.mxu0 %v2031_v50 }
 0x12a   : > { %1346 = vmatpush.bf16.msrb.mxu1 %v2039_v52 }
 0x12d   : > { %1333 = vmatpush.bf16.msrb.mxu0 %v2030_v51 }
 0x12e   : > { %1347 = vmatpush.bf16.msrb.mxu1 %v2038_v54 }
 0x131   : > { %1334 = vmatpush.bf16.msrb.mxu0 %v2029_v53 }
 0x132   : > { %1348 = vmatpush.bf16.msrb.mxu1 %v2037_v56 }
 0x135   : > { %1335 = vmatpush.bf16.msrb.mxu0 %v2028_v55 }
 0x136   : > { %1349 = vmatpush.bf16.msrb.mxu1 %v2036_v58 }
 0x139   : > { %1336 = vmatpush.bf16.msrb.mxu0 %v2027_v57 }
 0x13a   : > { %1350 = vmatpush.bf16.msrb.mxu1 %v2035_v61 }
 0x13d   : > { %1337 = vmatpush.bf16.msrb.mxu0 %v2026_v59 }
 0x13e   : > { %1351 = vmatpush.bf16.msrb.mxu1 %v2034_v62 }
 0x19d   : > { %v1133_v1 = vpop.f32.mrf.mxu0 }
 0x19e   : > { %v1134_v4 = vadd.f32 %v1133_v1, %v960_v0  ;;  %v1147_v6 = vpop.f32.mrf.mxu1 }
 0x1a0   : > { %v1148_v8 = vadd.f32 %v1147_v6, %v1134_v4 }
 0x1a2   : > { %v1184_v13 = vmul.f32 0.2, %v1148_v8  ;;  %vm1180_vm4 = vcmp.ge.f32.partialorder %v1148_v8, 0.0 }
 0x1a4   : > { %v1188_v18 = vsel %vm1180_vm4, %v1148_v8, %v1184_v13 }
 0x1a5   : > { %v1161_v9 = vpop.f32.mrf.mxu2  ;;  %v1135_v12 = vpop.f32.mrf.mxu0  ;;  %v1192_v22 = vmul.f32 1.4142135, %v1188_v18 }
 0x1a6   : > { %v1162_v10 = vadd.f32 %v1161_v9, %v961_v7  ;;  %v1175_v11 = vpop.f32.mrf.mxu3  ;;  %v1136_v14 = vadd.f32 %v1135_v12, %v960_v0  ;;  %v1149_v15 = vpop.f32.mrf.mxu1 }
 0x1a8   : > { %v1150_v16 = vadd.f32 %v1149_v15, %v1136_v14  ;;  %v1176_v17 = vadd.f32 %v1175_v11, %v1162_v10 }
 0x1aa   : > { %vm1182_vm5 = vcmp.ge.f32.partialorder %v1150_v16, 0.0  ;;  %v1186_v19 = vmul.f32 0.2, %v1150_v16  ;;  %v1185_v23 = vmul.f32 0.2, %v1176_v17  ;;  %vm1181_vm6 = vcmp.ge.f32.partialorder %v1176_v17, 0.0 }
 0x1ac   : > { %v1190_v20 = vsel %vm1182_vm5, %v1150_v16, %v1186_v19  ;;  %v1189_v29 = vsel %vm1181_vm6, %v1176_v17, %v1185_v23 }
 0x1ad   : > { %v1163_v21 = vpop.f32.mrf.mxu2  ;;  %v1194_v24 = vmul.f32 1.4142135, %v1190_v20  ;;  %v1193_v32 = vmul.f32 1.4142135, %v1189_v29 }
 0x1ae   : > { %v1164_v25 = vadd.f32 %v1163_v21, %v961_v7  ;;  %v1177_v26 = vpop.f32.mrf.mxu3 }
 0x1af   : > { %v1228_v28 = vpack.c.bf16 %v1194_v24, %v1192_v22 }
 0x1b0   : > { %v1178_v27 = vadd.f32 %v1177_v26, %v1164_v25 }
 0x1b1   : > { %1338 = vmatmul.bf16.vlgmr.msrb.gmra.mxu0 %v1228_v28 }
 0x1b2   : > { %vm1183_vm7 = vcmp.ge.f32.partialorder %v1178_v27, 0.0  ;;  %v1187_v30 = vmul.f32 0.2, %v1178_v27 }
 0x1b4   : > { %v1191_v31 = vsel %vm1183_vm7, %v1178_v27, %v1187_v30 }
 0x1b5   : > { %v1195_v3 = vmul.f32 1.4142135, %v1191_v31 }
 0x1b7   : > { %v1229_v33 = vpack.c.bf16 %v1195_v3, %v1193_v32 }
 0x1b9   : > { %1352 = vmatmul.bf16.vlgmr.msrb.gmra.mxu1 %v1229_v33 }
 0x22e   : > { %v1339_v5 = vpop.f32.mrf.mxu0 }
 0x22f   : > { %v1340_v60 = vadd.f32 %v2083_v34, %v1339_v5 }
 0x236   : > { %v1353_v35 = vpop.f32.mrf.mxu1  ;;  %v1341_v36 = vpop.f32.mrf.mxu0 }
 0x237   : > { %v1354_v2 = vadd.f32 %v1353_v35, %v1340_v60  ;;  %v1342_v37 = vadd.f32 %v2083_v34, %v1341_v36 }
 0x239   : > { %1358 = vst [vmem:[%s2650_s7] sm:$0xff] %v1354_v2 }
 0x23e   : > { %v1355_v38 = vpop.f32.mrf.mxu1 }
 0x23f   : > { %v1356_v39 = vadd.f32 %v1355_v38, %v1342_v37 }
 0x241   : > { %1359 = vst [vmem:[%s2650_s7 + $0x8] sm:$0xff] %v1356_v39 }
 0x242 PF: > { %s17_s28 = sadd.s32 1, %s2122_s28   ;;  %s2651_s24 = smov %s2110_s25 }
 0x243   : > { %p14_p12 = scmp.ge.s32.totalorder %s17_s28, 4   ;;  %s2652_s25 = smov %s2200_s9 }
 0x244   : > { %s2653_s26 = smov %s2118_s27  ;;  %s2654_s27 = smov %s2656_s29 }
 0x245   :  { %16 = sbr.rel (!%p14_p12) target bundleno = 3 (0x3), region = 117 }

</bundles_post_ra>
